<compile_context>
chip_gen: v6e
topology: v6e:2x2x1
jax: 0.10.0
libtpu: 0.0.40
codegen_flags: <defaults>
</compile_context>

<pallas_src>
import math
import functools

import numpy as np
import jax
import jax.numpy as jnp
from jax.experimental import pallas as pl
from jax.experimental.pallas import tpu as pltpu


# ----------------------------------------------------------------------------
# Kernel 1: fused QKV projection + LoRA + RoPE
# ----------------------------------------------------------------------------
def _rope_rotate(x2, cosf, sinf):
    """Interleaved-pair rotary embedding on a lane-dense (S, W) slab.

    out[:, 2i]   = x[:, 2i]*cos_i - x[:, 2i+1]*sin_i
    out[:, 2i+1] = x[:, 2i]*sin_i + x[:, 2i+1]*cos_i
    cosf/sinf are full-width tables with the (+/-)sign already folded into sinf.
    """
    S, W = x2.shape
    left = jnp.concatenate([x2[:, 1:], x2[:, :1]], axis=-1)        # x[j+1]
    right = jnp.concatenate([x2[:, W - 1:], x2[:, :W - 1]], axis=-1)  # x[j-1]
    lane = jax.lax.broadcasted_iota(jnp.int32, (S, W), 1)
    partner = jnp.where((lane % 2) == 0, left, right)
    return x2 * cosf + partner * sinf


def _qkv_kernel(x_ref, w_ref, a_ref, b_ref, cos_ref, sin_ref,
                q_ref, k_ref, v_ref, *, q_out, kv_out):
    x = x_ref[0]                                        # (S, dim) f32
    xb = x.astype(jnp.bfloat16)
    # base projection against concatenated [Wq;Wk;Wv]^T  -> (S, q_out+2*kv_out)
    y = jnp.dot(xb, w_ref[...], preferred_element_type=jnp.float32)
    # shared LoRA path: one (S, 3r) product, block-diagonal B (scale folded)
    la = jnp.dot(xb, a_ref[...], preferred_element_type=jnp.float32)
    y = y + jnp.dot(la.astype(jnp.bfloat16), b_ref[...],
                    preferred_element_type=jnp.float32)

    cosf = cos_ref[...]                                 # (S, q_out) f32
    sinf = sin_ref[...]
    q = _rope_rotate(y[:, :q_out], cosf, sinf)
    k = _rope_rotate(y[:, q_out:q_out + kv_out],
                     cosf[:, :kv_out], sinf[:, :kv_out])
    q_ref[0] = q.astype(q_ref.dtype)
    k_ref[0] = k.astype(k_ref.dtype)
    v_ref[0] = y[:, q_out + kv_out:].astype(v_ref.dtype)


def fused_qkv_lora_rope(x, w_qkv_t, a_t, b_t, cosf, sinf, *,
                        n_heads, n_kv_heads, head_dim):
    B, S, dim = x.shape
    q_out = n_heads * head_dim
    kv_out = n_kv_heads * head_dim
    n_tot = q_out + 2 * kv_out
    r3 = a_t.shape[1]
    kernel = functools.partial(_qkv_kernel, q_out=q_out, kv_out=kv_out)
    return pl.pallas_call(
        kernel,
        out_shape=(jax.ShapeDtypeStruct((B, S, q_out), jnp.float32),
                   jax.ShapeDtypeStruct((B, S, kv_out), jnp.float32),
                   jax.ShapeDtypeStruct((B, S, kv_out), jnp.float32)),
        grid=(B,),
        in_specs=[
            pl.BlockSpec((1, S, dim), lambda b: (b, 0, 0)),
            pl.BlockSpec((dim, n_tot), lambda b: (0, 0)),
            pl.BlockSpec((dim, r3), lambda b: (0, 0)),
            pl.BlockSpec((r3, n_tot), lambda b: (0, 0)),
            pl.BlockSpec((S, q_out), lambda b: (0, 0)),
            pl.BlockSpec((S, q_out), lambda b: (0, 0)),
        ],
        out_specs=(pl.BlockSpec((1, S, q_out), lambda b: (b, 0, 0)),
                   pl.BlockSpec((1, S, kv_out), lambda b: (b, 0, 0)),
                   pl.BlockSpec((1, S, kv_out), lambda b: (b, 0, 0))),
        compiler_params=pltpu.CompilerParams(
            dimension_semantics=("parallel",)),
    )(x, w_qkv_t, a_t, b_t, cosf, sinf)


# ----------------------------------------------------------------------------
# Kernel 2: in-place KV-cache update (aliased outputs, DMA only the new rows)
# ----------------------------------------------------------------------------
def _kv_cache_kernel(xk_ref, xv_ref, ck_in, cv_in, ck_out, cv_out, sem,
                     *, start_pos, bsz, seqlen):
    del ck_in, cv_in  # aliased with the outputs; only new rows are written
    ck = pltpu.make_async_copy(
        xk_ref, ck_out.at[pl.ds(0, bsz), pl.ds(start_pos, seqlen)], sem.at[0])
    cv = pltpu.make_async_copy(
        xv_ref, cv_out.at[pl.ds(0, bsz), pl.ds(start_pos, seqlen)], sem.at[1])
    ck.start()
    cv.start()
    ck.wait()
    cv.wait()


def kv_cache_update(xk, xv, cache_k, cache_v, start_pos):
    bsz, seqlen = xk.shape[0], xk.shape[1]
    kernel = functools.partial(_kv_cache_kernel, start_pos=start_pos,
                               bsz=bsz, seqlen=seqlen)
    return pl.pallas_call(
        kernel,
        out_shape=(jax.ShapeDtypeStruct(cache_k.shape, cache_k.dtype),
                   jax.ShapeDtypeStruct(cache_v.shape, cache_v.dtype)),
        in_specs=[
            pl.BlockSpec(memory_space=pltpu.MemorySpace.VMEM),
            pl.BlockSpec(memory_space=pltpu.MemorySpace.VMEM),
            pl.BlockSpec(memory_space=pl.ANY),
            pl.BlockSpec(memory_space=pl.ANY),
        ],
        out_specs=(pl.BlockSpec(memory_space=pl.ANY),
                   pl.BlockSpec(memory_space=pl.ANY)),
        scratch_shapes=[pltpu.SemaphoreType.DMA((2,))],
        input_output_aliases={2: 0, 3: 1},
    )(xk, xv, cache_k, cache_v)


# ----------------------------------------------------------------------------
# Kernel 3: GQA attention core (grid over batch, all heads per step,
#           un-repeated KV cache, lane-dense (S, H*D) output)
# ----------------------------------------------------------------------------
def _attn_kernel(q_ref, k_ref, v_ref, mask_ref, o_ref,
                 *, n_heads, n_rep, head_dim, sm_scale):
    mask = mask_ref[...]                                 # (S, T) f32
    n_kv = n_heads // n_rep
    outs = []
    for g in range(n_kv):                                # static unroll (GQA groups)
        kg = k_ref[0, :, g, :].astype(jnp.bfloat16)      # (T, D) -- read once/group
        vg = v_ref[0, :, g, :].astype(jnp.bfloat16)
        for r in range(n_rep):
            h = g * n_rep + r                            # repeat_interleave mapping
            qh = (q_ref[0, :, h * head_dim:(h + 1) * head_dim]
                  * sm_scale).astype(jnp.bfloat16)       # scale folded into q
            # q @ k^T without an explicit transpose (contract dim 1 vs dim 1)
            sc = jax.lax.dot_general(qh, kg, (((1,), (1,)), ((), ())),
                                     preferred_element_type=jnp.float32)
            sc = sc + mask
            m = jnp.max(sc, axis=-1, keepdims=True)
            p = jnp.exp(sc - m)
            denom = jnp.sum(p, axis=-1, keepdims=True)
            p = p * pl.reciprocal(denom, approx=True)    # EUP, frees VALU slots
            outs.append(jnp.dot(p.astype(jnp.bfloat16), vg,
                                preferred_element_type=jnp.float32))
    # single lane-dense store, already in (S, n_heads*head_dim) layout
    o_ref[0] = jnp.concatenate(outs, axis=-1).astype(o_ref.dtype)


def attention_gqa(q, cache_k, cache_v, mask, *, total, n_heads, n_kv_heads,
                  head_dim):
    B, S, q_width = q.shape
    kernel = functools.partial(_attn_kernel, n_heads=n_heads,
                               n_rep=n_heads // n_kv_heads,
                               head_dim=head_dim,
                               sm_scale=1.0 / math.sqrt(head_dim))
    return pl.pallas_call(
        kernel,
        out_shape=jax.ShapeDtypeStruct((B, S, q_width), jnp.float32),
        grid=(B,),
        in_specs=[
            pl.BlockSpec((1, S, q_width), lambda b: (b, 0, 0)),
            # read the un-repeated KV cache directly: only the first `total`
            # rows of batch b are DMA'd -- no repeat_kv, no cache slice copy.
            pl.BlockSpec((1, total, n_kv_heads, head_dim),
                         lambda b: (b, 0, 0, 0)),
            pl.BlockSpec((1, total, n_kv_heads, head_dim),
                         lambda b: (b, 0, 0, 0)),
            pl.BlockSpec((S, total), lambda b: (0, 0)),
        ],
        out_specs=pl.BlockSpec((1, S, q_width), lambda b: (b, 0, 0)),
        compiler_params=pltpu.CompilerParams(
            dimension_semantics=("parallel",)),
    )(q, cache_k, cache_v, mask)


# ----------------------------------------------------------------------------
# Kernel 4: output projection + LoRA (LoRA input is the ORIGINAL x, per module)
# ----------------------------------------------------------------------------
def _o_proj_kernel(attn_ref, x_ref, w_ref, a_ref, b_ref, o_ref):
    h = attn_ref[...].astype(jnp.bfloat16)
    xl = x_ref[...].astype(jnp.bfloat16)
    y = jnp.dot(h, w_ref[...], preferred_element_type=jnp.float32)
    la = jnp.dot(xl, a_ref[...], preferred_element_type=jnp.float32)
    y = y + jnp.dot(la.astype(jnp.bfloat16), b_ref[...],
                    preferred_element_type=jnp.float32)
    o_ref[...] = y.astype(o_ref.dtype)


def o_proj_lora(attn2d, xf, w_o_t, a_t, b_t):
    M = attn2d.shape[0]
    N = w_o_t.shape[1]
    return pl.pallas_call(
        _o_proj_kernel,
        out_shape=jax.ShapeDtypeStruct((M, N), jnp.float32),
    )(attn2d, xf, w_o_t, a_t, b_t)


# ----------------------------------------------------------------------------
# Module wrapper (parameter container + forward)
# ----------------------------------------------------------------------------
class AttentionPallas:
    def __init__(self, rank, alpha, *, dim, n_heads, n_kv_heads,
                 max_batch_size, max_seq_len, key):
        self.rank = rank
        self.alpha = alpha
        self.n_heads = n_heads
        self.n_kv_heads = n_kv_heads
        self.n_rep = n_heads // n_kv_heads
        self.head_dim = dim // n_heads
        self.dim = dim

        q_out = n_heads * self.head_dim
        kv_out = n_kv_heads * self.head_dim
        scale = alpha / rank

        ks = jax.random.split(key, 12)
        sc = 0.05  # keep values tame; shapes follow the torch module exactly
        w_q = sc * jax.random.normal(ks[0], (q_out, dim), jnp.float32)
        w_k = sc * jax.random.normal(ks[1], (kv_out, dim), jnp.float32)
        w_v = sc * jax.random.normal(ks[2], (kv_out, dim), jnp.float32)
        w_o = sc * jax.random.normal(ks[3], (dim, q_out), jnp.float32)
        # NOTE: torch module zero-inits LoRA weights; use small random values to
        # actually exercise the LoRA path (shapes identical).
        a_q = sc * jax.random.normal(ks[4], (rank, dim), jnp.float32)
        b_q = sc * jax.random.normal(ks[5], (q_out, rank), jnp.float32)
        a_k = sc * jax.random.normal(ks[6], (rank, dim), jnp.float32)
        b_k = sc * jax.random.normal(ks[7], (kv_out, rank), jnp.float32)
        a_v = sc * jax.random.normal(ks[8], (rank, dim), jnp.float32)
        b_v = sc * jax.random.normal(ks[9], (kv_out, rank), jnp.float32)
        a_o = sc * jax.random.normal(ks[10], (rank, q_out), jnp.float32)
        b_o = sc * jax.random.normal(ks[11], (dim, rank), jnp.float32)

        # Fused, matmul-ready bf16 parameters.
        n_tot = q_out + 2 * kv_out
        self.w_qkv_t = jnp.concatenate([w_q.T, w_k.T, w_v.T],
                                       axis=1).astype(jnp.bfloat16)
        self.lora_a_t = jnp.concatenate([a_q.T, a_k.T, a_v.T],
                                        axis=1).astype(jnp.bfloat16)
        b_blk = jnp.zeros((3 * rank, n_tot), jnp.float32)
        b_blk = b_blk.at[0:rank, 0:q_out].set(scale * b_q.T)
        b_blk = b_blk.at[rank:2 * rank, q_out:q_out + kv_out].set(scale * b_k.T)
        b_blk = b_blk.at[2 * rank:, q_out + kv_out:].set(scale * b_v.T)
        self.lora_b_t = b_blk.astype(jnp.bfloat16)
        self.w_o_t = w_o.T.astype(jnp.bfloat16)                  # (q_out, dim)
        self.lora_oa_t = a_o.T.astype(jnp.bfloat16)              # (dim, rank)
        self.lora_ob_t = (scale * b_o.T).astype(jnp.bfloat16)    # (rank, dim)

        self.cache_k = jnp.zeros((max_batch_size, max_seq_len, n_kv_heads,
                                  self.head_dim), jnp.float32)
        self.cache_v = jnp.zeros_like(self.cache_k)

    def forward(self, x, start_pos, cos, sin, mask):
        bsz, seqlen, _ = x.shape
        q_out = self.n_heads * self.head_dim

        # Full-width, lane-dense RoPE tables (S, n_heads*head_dim); the (+/-)
        # sign of the complex multiply is folded into sinF.
        cos2 = jnp.repeat(cos, 2, axis=-1)                       # (S, head_dim)
        sin2 = jnp.repeat(sin, 2, axis=-1)
        sign = jnp.tile(jnp.array([-1.0, 1.0], dtype=jnp.float32),
                        self.head_dim // 2)
        cosf = jnp.tile(cos2, (1, self.n_heads))                 # (S, q_out)
        sinf = jnp.tile(sin2 * sign, (1, self.n_heads))

        xq, xk, xv = fused_qkv_lora_rope(
            x, self.w_qkv_t, self.lora_a_t, self.lora_b_t, cosf, sinf,
            n_heads=self.n_heads, n_kv_heads=self.n_kv_heads,
            head_dim=self.head_dim)

        # In-place KV-cache update (aliased); keep the returned buffers so the
        # cache actually persists across forward calls.
        xk4 = xk.reshape(bsz, seqlen, self.n_kv_heads, self.head_dim)
        xv4 = xv.reshape(bsz, seqlen, self.n_kv_heads, self.head_dim)
        self.cache_k, self.cache_v = kv_cache_update(
            xk4, xv4, self.cache_k, self.cache_v, start_pos)

        total = start_pos + seqlen
        attn = attention_gqa(xq, self.cache_k, self.cache_v, mask,
                             total=total, n_heads=self.n_heads,
                             n_kv_heads=self.n_kv_heads,
                             head_dim=self.head_dim)       # (B, S, q_out)

        xf = x.reshape(bsz * seqlen, self.dim)
        out2d = attn.reshape(bsz * seqlen, q_out)           # contiguous, free
        y = o_proj_lora(out2d, xf, self.w_o_t, self.lora_oa_t, self.lora_ob_t)
        return y.reshape(bsz, seqlen, self.dim)


# ----------------------------------------------------------------------------
# Pure-JAX reference with the same bf16/f32 precision policy (for the check)
# ----------------------------------------------------------------------------
def reference_forward(m, x, start_pos, cos, sin, mask):
    bsz, seqlen, _ = x.shape
    bf16, f32 = jnp.bfloat16, jnp.float32
    q_out = m.n_heads * m.head_dim
    kv_out = m.n_kv_heads * m.head_dim

    xf = x.reshape(bsz * seqlen, m.dim)
    xb = xf.astype(bf16)
    y = jnp.dot(xb, m.w_qkv_t, preferred_element_type=f32)
    la = jnp.dot(xb, m.lora_a_t, preferred_element_type=f32)
    y = y + jnp.dot(la.astype(bf16), m.lora_b_t, preferred_element_type=f32)

    xq = y[:, :q_out].reshape(bsz, seqlen, m.n_heads, m.head_dim)
    xk = y[:, q_out:q_out + kv_out].reshape(bsz, seqlen, m.n_kv_heads, m.head_dim)
    xv = y[:, q_out + kv_out:].reshape(bsz, seqlen, m.n_kv_heads, m.head_dim)

    def rope(t):
        B, S, H, D = t.shape
        tp = t.reshape(B, S, H, D // 2, 2)
        tr, ti = tp[..., 0], tp[..., 1]
        c = cos[None, :, None, :]
        s = sin[None, :, None, :]
        return jnp.stack([tr * c - ti * s, tr * s + ti * c],
                         axis=-1).reshape(B, S, H, D)

    xq, xk = rope(xq), rope(xk)

    cache_k = m.cache_k.at[:bsz, start_pos:start_pos + seqlen].set(xk)
    cache_v = m.cache_v.at[:bsz, start_pos:start_pos + seqlen].set(xv)
    total = start_pos + seqlen
    keys = jnp.repeat(cache_k[:bsz, :total], m.n_rep, axis=2)
    values = jnp.repeat(cache_v[:bsz, :total], m.n_rep, axis=2)

    sm_scale = 1.0 / math.sqrt(m.head_dim)
    qh = jnp.transpose(xq * sm_scale, (0, 2, 1, 3)).astype(bf16)
    kh = jnp.transpose(keys, (0, 2, 1, 3)).astype(bf16)
    vh = jnp.transpose(values, (0, 2, 1, 3)).astype(bf16)

    scores = jnp.einsum('bhsd,bhtd->bhst', qh, kh,
                        preferred_element_type=f32) + mask[None, None]
    mx = jnp.max(scores, axis=-1, keepdims=True)
    p = jnp.exp(scores - mx)
    p = p / jnp.sum(p, axis=-1, keepdims=True)
    out = jnp.einsum('bhst,bhtd->bhsd', p.astype(bf16), vh,
                     preferred_element_type=f32)
    out = jnp.transpose(out, (0, 2, 1, 3)).reshape(bsz * seqlen, q_out)

    o = jnp.dot(out.astype(bf16), m.w_o_t, preferred_element_type=f32)
    o = o + jnp.dot(jnp.dot(xb, m.lora_oa_t, preferred_element_type=f32
                            ).astype(bf16),
                    m.lora_ob_t, preferred_element_type=f32)
    return o.reshape(bsz, seqlen, m.dim)


# ----------------------------------------------------------------------------
if __name__ == "__main__":
    # small ModelArgs-consistent config
    dim, n_heads, n_kv_heads = 32, 4, 2
    rank, alpha = 4, 8.0
    bsz, seqlen, start_pos = 2, 8, 4
    max_batch_size, max_seq_len = 4, 16
    rope_theta = 500000.0
    head_dim = dim // n_heads

    key = jax.random.PRNGKey(0)
    k_param, k_x = jax.random.split(key)

    attn = AttentionPallas(rank, alpha, dim=dim, n_heads=n_heads,
                           n_kv_heads=n_kv_heads,
                           max_batch_size=max_batch_size,
                           max_seq_len=max_seq_len, key=k_param)

    x = jax.random.normal(k_x, (bsz, seqlen, dim), jnp.float32)

    # freqs_cis equivalent (cos/sin), sliced at [start_pos : start_pos+seqlen]
    freqs = 1.0 / (rope_theta ** (jnp.arange(0, head_dim, 2,
                                             dtype=jnp.float32) / head_dim))
    t = jnp.arange(start_pos, start_pos + seqlen, dtype=jnp.float32)
    angles = jnp.outer(t, freqs)                        # (seqlen, head_dim//2)
    cos, sin = jnp.cos(angles), jnp.sin(angles)

    # llama-style causal mask: (seqlen, start_pos + seqlen)
    total = start_pos + seqlen
    neg = jnp.float32(-1e30)
    causal = jnp.triu(jnp.full((seqlen, seqlen), neg, jnp.float32), k=1)
    mask = jnp.concatenate([jnp.zeros((seqlen, start_pos), jnp.float32),
                            causal], axis=1)

    # reference first (uses the pristine zero cache), then the Pallas path
    ref = reference_forward(attn, x, start_pos, cos, sin, mask)
    out = attn.forward(x, start_pos, cos, sin, mask)
    out = jax.block_until_ready(out)

    np.testing.assert_allclose(np.asarray(out), np.asarray(ref),
                               rtol=2e-2, atol=2e-2)
    print("KERNEL_OK")
</pallas_src>

<mosaic_0001>
module attributes {stable_mosaic.version = 11 : i64} {
  func.func @_qkv_kernel(%arg0: i32, %arg1: memref<1x8x32xf32, #tpu.memory_space<vmem>>, %arg2: memref<32x64xbf16, #tpu.memory_space<vmem>>, %arg3: memref<32x12xbf16, #tpu.memory_space<vmem>>, %arg4: memref<12x64xbf16, #tpu.memory_space<vmem>>, %arg5: memref<8x32xf32, #tpu.memory_space<vmem>>, %arg6: memref<8x32xf32, #tpu.memory_space<vmem>>, %arg7: memref<1x8x32xf32, #tpu.memory_space<vmem>>, %arg8: memref<1x8x16xf32, #tpu.memory_space<vmem>>, %arg9: memref<1x8x16xf32, #tpu.memory_space<vmem>>) attributes {dimension_semantics = [#tpu.dimension_semantics<parallel>], iteration_bounds = array<i64: 2>, scalar_prefetch = 0 : i64, scratch_operands = 0 : i64, tpu.core_type = #tpu.core_type<tc>, window_params = [{transform_indices = @transform_0, window_bounds = array<i64: 1, 8, 32>}, {pipeline_mode = #tpu.pipeline_mode<synchronous>, transform_indices = @transform_1, window_bounds = array<i64: 32, 64>}, {pipeline_mode = #tpu.pipeline_mode<synchronous>, transform_indices = @transform_2, window_bounds = array<i64: 32, 12>}, {pipeline_mode = #tpu.pipeline_mode<synchronous>, transform_indices = @transform_3, window_bounds = array<i64: 12, 64>}, {pipeline_mode = #tpu.pipeline_mode<synchronous>, transform_indices = @transform_4, window_bounds = array<i64: 8, 32>}, {pipeline_mode = #tpu.pipeline_mode<synchronous>, transform_indices = @transform_5, window_bounds = array<i64: 8, 32>}, {transform_indices = @transform_6, window_bounds = array<i64: 1, 8, 32>}, {transform_indices = @transform_7, window_bounds = array<i64: 1, 8, 16>}, {transform_indices = @transform_8, window_bounds = array<i64: 1, 8, 16>}]} {
    %c0 = arith.constant 0 : index
    %c0_0 = arith.constant 0 : index
    %c0_1 = arith.constant 0 : index
    %0 = vector.load %arg1[%c0, %c0_0, %c0_1] : memref<1x8x32xf32, #tpu.memory_space<vmem>>, vector<1x8x32xf32>
    %1 = vector.shape_cast %0 : vector<1x8x32xf32> to vector<8x32xf32>
    %2 = arith.truncf %1 : vector<8x32xf32> to vector<8x32xbf16>
    %c0_2 = arith.constant 0 : index
    %c0_3 = arith.constant 0 : index
    %3 = vector.load %arg2[%c0_2, %c0_3] : memref<32x64xbf16, #tpu.memory_space<vmem>>, vector<32x64xbf16>
    %cst = arith.constant dense<0.000000e+00> : vector<8x64xf32>
    %4 = tpu.matmul %2, %3, %cst {dimension_numbers = #tpu.dot_dimension_numbers<[1], [0], [0], [1], [0, 0, 1, 1], [], []>} : vector<8x32xbf16>, vector<32x64xbf16>, vector<8x64xf32> -> vector<8x64xf32>
    %c0_4 = arith.constant 0 : index
    %c0_5 = arith.constant 0 : index
    %5 = vector.load %arg3[%c0_4, %c0_5] : memref<32x12xbf16, #tpu.memory_space<vmem>>, vector<32x12xbf16>
    %cst_6 = arith.constant dense<0.000000e+00> : vector<8x12xf32>
    %6 = tpu.matmul %2, %5, %cst_6 {dimension_numbers = #tpu.dot_dimension_numbers<[1], [0], [0], [1], [0, 0, 1, 1], [], []>} : vector<8x32xbf16>, vector<32x12xbf16>, vector<8x12xf32> -> vector<8x12xf32>
    %7 = arith.truncf %6 : vector<8x12xf32> to vector<8x12xbf16>
    %c0_7 = arith.constant 0 : index
    %c0_8 = arith.constant 0 : index
    %8 = vector.load %arg4[%c0_7, %c0_8] : memref<12x64xbf16, #tpu.memory_space<vmem>>, vector<12x64xbf16>
    %cst_9 = arith.constant dense<0.000000e+00> : vector<8x64xf32>
    %9 = tpu.matmul %7, %8, %cst_9 {dimension_numbers = #tpu.dot_dimension_numbers<[1], [0], [0], [1], [0, 0, 1, 1], [], []>} : vector<8x12xbf16>, vector<12x64xbf16>, vector<8x64xf32> -> vector<8x64xf32>
    %10 = arith.addf %4, %9 : vector<8x64xf32>
    %c0_10 = arith.constant 0 : index
    %c0_11 = arith.constant 0 : index
    %11 = vector.load %arg5[%c0_10, %c0_11] : memref<8x32xf32, #tpu.memory_space<vmem>>, vector<8x32xf32>
    %c0_12 = arith.constant 0 : index
    %c0_13 = arith.constant 0 : index
    %12 = vector.load %arg6[%c0_12, %c0_13] : memref<8x32xf32, #tpu.memory_space<vmem>>, vector<8x32xf32>
    %13 = vector.extract_strided_slice %10 {offsets = [0, 0], sizes = [8, 32], strides = [1, 1]} : vector<8x64xf32> to vector<8x32xf32>
    %14 = vector.extract_strided_slice %13 {offsets = [0, 1], sizes = [8, 31], strides = [1, 1]} : vector<8x32xf32> to vector<8x31xf32>
    %15 = vector.extract_strided_slice %13 {offsets = [0, 0], sizes = [8, 1], strides = [1, 1]} : vector<8x32xf32> to vector<8x1xf32>
    %16 = tpu.concatenate %14, %15 in 1 : vector<8x31xf32>, vector<8x1xf32> -> vector<8x32xf32>
    %17 = vector.extract_strided_slice %13 {offsets = [0, 31], sizes = [8, 1], strides = [1, 1]} : vector<8x32xf32> to vector<8x1xf32>
    %18 = vector.extract_strided_slice %13 {offsets = [0, 0], sizes = [8, 31], strides = [1, 1]} : vector<8x32xf32> to vector<8x31xf32>
    %19 = tpu.concatenate %17, %18 in 1 : vector<8x1xf32>, vector<8x31xf32> -> vector<8x32xf32>
    %20 = tpu.iota {dimensions = array<i32: 1>} : vector<8x32xi32>
    %c2_i32 = arith.constant 2 : i32
    %c0_i32 = arith.constant 0 : i32
    %21 = arith.cmpi eq, %c2_i32, %c0_i32 : i32
    %c1_i32 = arith.constant 1 : i32
    %22 = arith.select %21, %c1_i32, %c2_i32 : i32
    %23 = vector.broadcast %22 : i32 to vector<8x32xi32>
    %24 = arith.remsi %20, %23 : vector<8x32xi32>
    %c0_i32_14 = arith.constant 0 : i32
    %25 = vector.broadcast %c0_i32_14 : i32 to vector<8x32xi32>
    %26 = arith.cmpi ne, %24, %25 : vector<8x32xi32>
    %c0_i32_15 = arith.constant 0 : i32
    %27 = vector.broadcast %c0_i32_15 : i32 to vector<8x32xi32>
    %28 = arith.cmpi slt, %24, %27 : vector<8x32xi32>
    %c0_i32_16 = arith.constant 0 : i32
    %29 = arith.cmpi slt, %22, %c0_i32_16 : i32
    %30 = vector.broadcast %29 : i1 to vector<8x32xi1>
    %31 = vector.broadcast %30 : vector<8x32xi1> to vector<8x32xi1>
    %32 = arith.xori %28, %31 : vector<8x32xi1>
    %33 = arith.andi %32, %26 : vector<8x32xi1>
    %34 = vector.broadcast %22 : i32 to vector<8x32xi32>
    %35 = arith.addi %24, %34 : vector<8x32xi32>
    %36 = arith.select %33, %35, %24 : vector<8x32xi1>, vector<8x32xi32>
    %c0_i32_17 = arith.constant 0 : i32
    %37 = vector.broadcast %c0_i32_17 : i32 to vector<8x32xi32>
    %38 = arith.cmpi eq, %36, %37 : vector<8x32xi32>
    %39 = arith.select %38, %16, %19 : vector<8x32xi1>, vector<8x32xf32>
    %40 = arith.mulf %13, %11 : vector<8x32xf32>
    %41 = arith.mulf %39, %12 : vector<8x32xf32>
    %42 = arith.addf %40, %41 : vector<8x32xf32>
    %43 = vector.extract_strided_slice %10 {offsets = [0, 32], sizes = [8, 16], strides = [1, 1]} : vector<8x64xf32> to vector<8x16xf32>
    %44 = vector.extract_strided_slice %11 {offsets = [0, 0], sizes = [8, 16], strides = [1, 1]} : vector<8x32xf32> to vector<8x16xf32>
    %45 = vector.extract_strided_slice %12 {offsets = [0, 0], sizes = [8, 16], strides = [1, 1]} : vector<8x32xf32> to vector<8x16xf32>
    %46 = vector.extract_strided_slice %43 {offsets = [0, 1], sizes = [8, 15], strides = [1, 1]} : vector<8x16xf32> to vector<8x15xf32>
    %47 = vector.extract_strided_slice %43 {offsets = [0, 0], sizes = [8, 1], strides = [1, 1]} : vector<8x16xf32> to vector<8x1xf32>
    %48 = tpu.concatenate %46, %47 in 1 : vector<8x15xf32>, vector<8x1xf32> -> vector<8x16xf32>
    %49 = vector.extract_strided_slice %43 {offsets = [0, 15], sizes = [8, 1], strides = [1, 1]} : vector<8x16xf32> to vector<8x1xf32>
    %50 = vector.extract_strided_slice %43 {offsets = [0, 0], sizes = [8, 15], strides = [1, 1]} : vector<8x16xf32> to vector<8x15xf32>
    %51 = tpu.concatenate %49, %50 in 1 : vector<8x1xf32>, vector<8x15xf32> -> vector<8x16xf32>
    %52 = tpu.iota {dimensions = array<i32: 1>} : vector<8x16xi32>
    %c2_i32_18 = arith.constant 2 : i32
    %c0_i32_19 = arith.constant 0 : i32
    %53 = arith.cmpi eq, %c2_i32_18, %c0_i32_19 : i32
    %c1_i32_20 = arith.constant 1 : i32
    %54 = arith.select %53, %c1_i32_20, %c2_i32_18 : i32
    %55 = vector.broadcast %54 : i32 to vector<8x16xi32>
    %56 = arith.remsi %52, %55 : vector<8x16xi32>
    %c0_i32_21 = arith.constant 0 : i32
    %57 = vector.broadcast %c0_i32_21 : i32 to vector<8x16xi32>
    %58 = arith.cmpi ne, %56, %57 : vector<8x16xi32>
    %c0_i32_22 = arith.constant 0 : i32
    %59 = vector.broadcast %c0_i32_22 : i32 to vector<8x16xi32>
    %60 = arith.cmpi slt, %56, %59 : vector<8x16xi32>
    %c0_i32_23 = arith.constant 0 : i32
    %61 = arith.cmpi slt, %54, %c0_i32_23 : i32
    %62 = vector.broadcast %61 : i1 to vector<8x16xi1>
    %63 = vector.broadcast %62 : vector<8x16xi1> to vector<8x16xi1>
    %64 = arith.xori %60, %63 : vector<8x16xi1>
    %65 = arith.andi %64, %58 : vector<8x16xi1>
    %66 = vector.broadcast %54 : i32 to vector<8x16xi32>
    %67 = arith.addi %56, %66 : vector<8x16xi32>
    %68 = arith.select %65, %67, %56 : vector<8x16xi1>, vector<8x16xi32>
    %c0_i32_24 = arith.constant 0 : i32
    %69 = vector.broadcast %c0_i32_24 : i32 to vector<8x16xi32>
    %70 = arith.cmpi eq, %68, %69 : vector<8x16xi32>
    %71 = arith.select %70, %48, %51 : vector<8x16xi1>, vector<8x16xf32>
    %72 = arith.mulf %43, %44 : vector<8x16xf32>
    %73 = arith.mulf %71, %45 : vector<8x16xf32>
    %74 = arith.addf %72, %73 : vector<8x16xf32>
    %c0_25 = arith.constant 0 : index
    %c0_26 = arith.constant 0 : index
    %c0_27 = arith.constant 0 : index
    %75 = vector.load %arg7[%c0_25, %c0_26, %c0_27] : memref<1x8x32xf32, #tpu.memory_space<vmem>>, vector<1x8x32xf32>
    %76 = vector.shape_cast %75 : vector<1x8x32xf32> to vector<8x32xf32>
    %77 = vector.shape_cast %42 : vector<8x32xf32> to vector<1x8x32xf32>
    tpu.vector_store %arg7[%c0_25, %c0_26, %c0_27], %77 {strides = array<i32>} : memref<1x8x32xf32, #tpu.memory_space<vmem>>, vector<1x8x32xf32>,
    %c0_28 = arith.constant 0 : index
    %c0_29 = arith.constant 0 : index
    %c0_30 = arith.constant 0 : index
    %78 = vector.load %arg8[%c0_28, %c0_29, %c0_30] : memref<1x8x16xf32, #tpu.memory_space<vmem>>, vector<1x8x16xf32>
    %79 = vector.shape_cast %78 : vector<1x8x16xf32> to vector<8x16xf32>
    %80 = vector.shape_cast %74 : vector<8x16xf32> to vector<1x8x16xf32>
    tpu.vector_store %arg8[%c0_28, %c0_29, %c0_30], %80 {strides = array<i32>} : memref<1x8x16xf32, #tpu.memory_space<vmem>>, vector<1x8x16xf32>,
    %81 = vector.extract_strided_slice %10 {offsets = [0, 48], sizes = [8, 16], strides = [1, 1]} : vector<8x64xf32> to vector<8x16xf32>
    %c0_31 = arith.constant 0 : index
    %c0_32 = arith.constant 0 : index
    %c0_33 = arith.constant 0 : index
    %82 = vector.load %arg9[%c0_31, %c0_32, %c0_33] : memref<1x8x16xf32, #tpu.memory_space<vmem>>, vector<1x8x16xf32>
    %83 = vector.shape_cast %82 : vector<1x8x16xf32> to vector<8x16xf32>
    %84 = vector.shape_cast %81 : vector<8x16xf32> to vector<1x8x16xf32>
    tpu.vector_store %arg9[%c0_31, %c0_32, %c0_33], %84 {strides = array<i32>} : memref<1x8x16xf32, #tpu.memory_space<vmem>>, vector<1x8x16xf32>,
    return
  }
  func.func @transform_0(%arg0: i32) -> (i32, i32, i32) {
    %c0_i32 = arith.constant 0 : i32
    %c0_i32_0 = arith.constant 0 : i32
    %c0_i32_1 = arith.constant 0 : i32
    return %arg0, %c0_i32, %c0_i32_0 : i32, i32, i32
  }
  func.func @transform_1(%arg0: i32) -> (i32, i32) {
    %c0_i32 = arith.constant 0 : i32
    %c0_i32_0 = arith.constant 0 : i32
    %c0_i32_1 = arith.constant 0 : i32
    return %c0_i32, %c0_i32_0 : i32, i32
  }
  func.func @transform_2(%arg0: i32) -> (i32, i32) {
    %c0_i32 = arith.constant 0 : i32
    %c0_i32_0 = arith.constant 0 : i32
    %c0_i32_1 = arith.constant 0 : i32
    return %c0_i32, %c0_i32_0 : i32, i32
  }
  func.func @transform_3(%arg0: i32) -> (i32, i32) {
    %c0_i32 = arith.constant 0 : i32
    %c0_i32_0 = arith.constant 0 : i32
    %c0_i32_1 = arith.constant 0 : i32
    return %c0_i32, %c0_i32_0 : i32, i32
  }
  func.func @transform_4(%arg0: i32) -> (i32, i32) {
    %c0_i32 = arith.constant 0 : i32
    %c0_i32_0 = arith.constant 0 : i32
    %c0_i32_1 = arith.constant 0 : i32
    return %c0_i32, %c0_i32_0 : i32, i32
  }
  func.func @transform_5(%arg0: i32) -> (i32, i32) {
    %c0_i32 = arith.constant 0 : i32
    %c0_i32_0 = arith.constant 0 : i32
    %c0_i32_1 = arith.constant 0 : i32
    return %c0_i32, %c0_i32_0 : i32, i32
  }
  func.func @transform_6(%arg0: i32) -> (i32, i32, i32) {
    %c0_i32 = arith.constant 0 : i32
    %c0_i32_0 = arith.constant 0 : i32
    %c0_i32_1 = arith.constant 0 : i32
    return %arg0, %c0_i32, %c0_i32_0 : i32, i32, i32
  }
  func.func @transform_7(%arg0: i32) -> (i32, i32, i32) {
    %c0_i32 = arith.constant 0 : i32
    %c0_i32_0 = arith.constant 0 : i32
    %c0_i32_1 = arith.constant 0 : i32
    return %arg0, %c0_i32, %c0_i32_0 : i32, i32, i32
  }
  func.func @transform_8(%arg0: i32) -> (i32, i32, i32) {
    %c0_i32 = arith.constant 0 : i32
    %c0_i32_0 = arith.constant 0 : i32
    %c0_i32_1 = arith.constant 0 : i32
    return %arg0, %c0_i32, %c0_i32_0 : i32, i32, i32
  }
}

</mosaic_0001>

<bundles_post_ra>
// kernel: tpu_custom_call.1
= control target key start
LH: loop header
LB: loop body
LE: loop exit
PB: predicated region body
PF: predicated region fallthrough
CT: control target
= control target key end

     0   :  { %s1411_s0 = inlined_call_operand.vmem [shape: f32[2,8,32], index: 0, kind: input, shape index: {}]   ;;  %s1412_s1 = inlined_call_operand.hbm [shape: bf16[32,64], index: 1, kind: input, shape index: {}]   ;;  %s1413_s2 = inlined_call_operand.vmem [shape: bf16[32,12], index: 2, kind: input, shape index: {}]   ;;  %s1414_s3 = inlined_call_operand.vmem [shape: bf16[12,64], index: 3, kind: input, shape index: {}]   ;;  %s1415_s4 = inlined_call_operand.hbm [shape: f32[8,32], index: 4, kind: input, shape index: {}]   ;;  %s1416_s5 = inlined_call_operand.vmem [shape: f32[8,32], index: 5, kind: input, shape index: {}]   ;;  %s1417_s6 = inlined_call_operand.hbm [shape: f32[2,8,32], index: 6, kind: output, shape index: {0}]   ;;  %s1418_s7 = inlined_call_operand.hbm [shape: f32[2,8,16], index: 7, kind: output, shape index: {1}]   ;;  %s1419_s8 = inlined_call_operand.hbm [shape: f32[2,8,16], index: 8, kind: output, shape index: {2}]  }
   0x1   :  { %1423 = sst [smem:[#allocation15_spill]] %s1411_s0 }
   0x2   :  { %1424 = sst [smem:[#allocation16_spill]] %s1412_s1 }
   0x3   :  { %14 = vsyncpa [#allocation3], 0 }
   0x4   :  { %15 = vsyncpa [#allocation6], 0 }
   0x5   :  { %16 = vsyncpa [#allocation4], 0 }
   0x6   :  { %18 = vsyncpa [#allocation4 + $0x1], 0 }
   0x7   :  { %19 = vsyncpa [#allocation9], 0 }
   0x8   :  { %21 = vsyncpa [#allocation9 + $0x1], 0  ;;  %s1176_s27 = smov 0   ;;  %s1178_s28 = smov 0  }
   0x9   :  { %s1180_s29 = smov 0   ;;  %s1182_s30 = smov 0  }
   0xa LB: > { %s1197_s9 = sadd.s32 4294967295, %s1110_s30   ;;  %s1421_s10 = sadd.s32 4294967294, %s1110_s30   ;;  %s1110_s30 = sphi %s1182_s30, %s1443_s30   ;;  %s1106_s29 = sphi %s1180_s29, %s1442_s29   ;;  %s1102_s28 = sphi %s1178_s28, %s1441_s28   ;;  %s1098_s27 = sphi %s1176_s27, %s1440_s27  }
   0xb   : > { %s1201_s11 = sadd.s32 1, %s1110_s30   ;;  %s165_s12 = sadd.s32 1, %s1106_s29 }
   0xc   : > { %s162_s13 = ssub.s32 %s1110_s30, %s1201_s11  ;;  %p175_p0 = scmp.ne.s32.totalorder %s1106_s29, %s1102_s28 }
   0xd   : > { %p163_p1 = scmp.eq.s32.totalorder %s162_s13, 0  ;;  %p176_p2 = scmp.eq.s32.totalorder %s1197_s9, 1 }
   0xe   : > { %p181_p3 = scmp.ne.s32.totalorder %s1102_s28, %s1098_s27  ;;  %p182_p4 = scmp.eq.s32.totalorder %s1421_s10, 1 }
   0xf   : > { %s1214_s14 = scalar_select %p163_p1, %s1106_s29, %s165_s12  }
  0x10   : > { %p1216_p5 = por %p176_p2, %p175_p0  ;;  %p1220_p6 = por %p182_p4, %p181_p3 }
  0x11   : > { %p788_p7 = scmp.ge.s32.totalorder %s1110_s30, 1  ;;  %p241_p8 = scmp.lt.s32.totalorder %s1110_s30, 3 }
  0x12   : > { %s1426_s16 = scalar_select %p1220_p6, 1, 0 }
  0x13   : > { %p1420_p9 = scmp.eq.s32.totalorder %s1197_s9, 0  ;;  %p1227_p10 = pnand %p788_p7, %p241_p8 }
  0x14   : > { %s1112_s18 = smov [#allocation2]   ;;  %s1113_s21 = smov [#allocation5]  }
  0x15   : > { %s253_s19 = sshll.u32 %s1112_s18, 4  ;;  %p859_p11 = pneg %p1227_p10  ;;  %s254_s19 = int_to_ptr.vmem [resolvable:$true] %s253_s19 }
  0x16   : > { %s273_s22 = sshll.u32 %s1113_s21, 4  ;;  %s945_s23 = scalar_lea.vmem %s254_s19, 256  ;;  %s274_s22 = int_to_ptr.vmem [resolvable:$true] %s273_s22 }
  0x17   : > { %p1235_p12 = pnand %p1420_p9, %p859_p11  ;;  %p946_p0 = scmp.ne.s32.totalorder %s254_s19, %s945_s23 }
  0x18   : > { %p953_p3 = scmp.lt.s32.totalorder %s254_s19, %s254_s19  ;;  %p954_p4 = scmp.lt.s32.totalorder %s945_s23, %s945_s23 }
  0x19   : > { %p936_p13 = pneg %p1235_p12 }
  0x1a   : > { %p955_p7 = por %p954_p4, %p953_p3 }
  0x1b   : > { %p948_p1 = pnand %p946_p0, %p936_p13 }
  0x1d   : > { %p949_p2 = pneg %p948_p1 }
  0x1f   : > { %p956_p8 = pnand %p955_p7, %p949_p2 }
  0x21   : > { %959 = shalt.err (!%p956_p8)
}
  0x22   : > { %s1114_s24 = smov 64   ;;  %s1115_s25 = smov 4  }
  0x23   : > { %s1429_s1 = sld [smem:[#allocation16_spill]]  ;;  %s971_s13 = scalar_lea.vmem %s274_s22, 128 }
  0x24   : > { %p972_p11 = scmp.ne.s32.totalorder %s274_s22, %s971_s13  ;;  %p979_p9 = scmp.lt.s32.totalorder %s274_s22, %s274_s22 }
  0x25   : > { %p980_p6 = scmp.lt.s32.totalorder %s971_s13, %s971_s13 }
  0x26   : > { %p974_p0 = pnand %p972_p11, %p936_p13 }
  0x27   : > { %p981_p3 = por %p980_p6, %p979_p9 }
  0x28   : > { %p975_p1 = pneg %p974_p0 }
  0x29   : > { %862 = dma.hbm_to_vmem [thread:$0]  (!%p1235_p12), %s1429_s1, 256, %s254_s19, [#allocation3], %s1114_s24, %s1114_s24, %s1115_s25  }
  0x2a   : > { %p982_p2 = pnand %p981_p3, %p975_p1 }
  0x2c   : > { %985 = shalt.err (!%p982_p2)
}
  0x2d   : > { %865 = dma.hbm_to_vmem [thread:$0]  (!%p1235_p12), %s1415_s4, 128, %s274_s22, [#allocation6]  }
  0x2e   : > { %296 = sbr.rel (%p1227_p10) target bundleno = 852 (0x354), region = 44  ;;  %p1430_p4 = scmp.eq.s32.totalorder (!%p1227_p10), %s1197_s9, 0 }
  0x33   : > { %1081 = dma.done.wait (%p1430_p4), [#allocation3], 256   ;;  %p1431_p13 = pmov %p1430_p4 }
  0x34   : > { %p1432_p7 = pmov %p1430_p4 }
  0x35   : > { %1083 = vsyncadd (%p1431_p13), [#allocation3], 4294967040 }
  0x36   : > { %1085 = dma.done.wait (%p1432_p7), [#allocation6], 128   ;;  %p1433_p6 = pmov %p1430_p4 }
  0x37   : > { %p343_p9 = scmp.lt.s32.totalorder %s1197_s9, 1  ;;  %v1116_v0 = vmov 0.0   ;;  %vm1117_vm0 = vmmov 0   ;;  %s1434_s0 = sld [smem:[#allocation15_spill]]  ;;  %v929_v1 = vld [vmem:[%s1413_s2 + $0x8] sm:$0xff]   ;;  %v930_v2 = vld [vmem:[%s1413_s2] sm:$0xff]   ;;  %v541_v24 = vlaneseq }
  0x38   : > { %1087 = vsyncadd (%p1433_p6), [#allocation6], 4294967168  ;;  %823 = vmatprep.subr.bf16.mxu0 %v1116_v0  ;;  %827 = vmatprep.mubr.msk.bf16.mxu0 %vm1117_vm0, %v1116_v0  ;;  %vm426_vm1 = vcmask 1045504   ;;  %v931_v4 = vld [vmem:[%s1414_s3] sm:$0x3f]   ;;  %vm370_vm2 = vcmask 261120  }
  0x39   : > { %s344_s17 = scalar_select %p343_p9, %s1197_s9, 1  ;;  %831 = vmatprep.subr.bf16.mxu1 %v1116_v0  ;;  %833 = vmatprep.mubr.msk.bf16.mxu1 %vm1117_vm0, %v1116_v0  ;;  %v428_v6 = vsel %vm426_vm1, %v931_v4, 0  ;;  %vm422_vm3 = vcmask 97280   ;;  %v932_v8 = vld [vmem:[#allocation2 + $0x8] sm:$0xff]   ;;  %v933_v12 = vld [vmem:[#allocation2] sm:$0xff]   ;;  %v522_v23 = vld [vmem:[#allocation5] sm:$0xff] }
  0x3a   : > { %824 = vmatpush3.bf16.msra.mxu0 %v929_v1  ;;  %832 = vmatpush3.bf16.msra.mxu1 %v428_v6  ;;  %s1118_s21 = smov 111   ;;  %s1121_s20 = smov 95   ;;  %v542_v25 = vand.u32 127, %v541_v24  ;;  %vm539_vm4 = vcmask 7168   ;;  %vm566_vm5 = vcmask 121856   ;;  %v523_v32 = vld [vmem:[%s1416_s5] sm:$0xff] }
  0x3b   : > { %s798_s19 = sshll.u32 %s344_s17, 3  ;;  %825 = vmatprep.subr.bf16.mxu0 %v1116_v0  ;;  %837 = vmatprep.subr.bf16.mxu1 %v1116_v0  ;;  %s1119_s17 = smov 97   ;;  %vm589_vm7 = vcmask 130048   ;;  %vm531_vm8 = vcmask 252928  }
  0x3c   : > { %s1122_s22 = smov 32   ;;  %s1124_s24 = smov 1   ;;  %v547_v26 = vand.u32 1, %v542_v25 }
  0x3d   : > { %s346_s23 = scalar_lea.vmem %s1434_s0, %s798_s19  ;;  %s1120_s19 = smov 81  }
  0x3e   : > { %v348_v3 = vld [vmem:[%s346_s23] sm:$0xff]  ;;  %826 = vmatpush3.bf16.msra.mxu0 %v930_v2  ;;  %s1123_s23 = smov 127   ;;  %s1125_s25 = smov 80   ;;  %vm1286_vm6 = vcmp.eq.s32.totalorder %v547_v26, 0 }
  0x3f   : > { %v349_v5 = vpack.c.bf16 %v348_v3, %v348_v3  ;;  %s326_s13 = sand.u32 1, %s1102_s28   ;;  %s1126_s18 = smov 31  }
  0x40   : > { %s596_s12 = scalar_lea.sflag [#allocation4], %s326_s13 }
  0x41   : > { %828 = vmatmul.mubr.msk.bf16.vlgmr.msra.gmra.mxu0 %vm370_vm2, %v349_v5 }
 0x101   : > { %v408_v7 = vpop.f32.mrf.mxu0 }
 0x102   : > { %v414_v9 = vpack.c.bf16 %v408_v7, %v408_v7 }
 0x103   : > { %v829_v10 = vpop.f32.mrf.mxu0 }
 0x104   : > { %834 = vmatmul.mubr.msk.bf16.vlgmr.msra.gmra.mxu1 %vm422_vm3, %v414_v9 }
 0x105   : > { %838 = vmatpush3.bf16.msra.mxu1 %v932_v8  ;;  %v411_v11 = vpop.f32.mrf.mxu0  ;;  %841 = vmatprep.mubr.msk.bf16.mxu1 %vm1117_vm0, %v1116_v0 }
 0x106   : > { %839 = vmatprep.subr.bf16.mxu1 %v1116_v0 }
 0x107   : > { %v830_v13 = vpop.f32.mrf.mxu0 }
 0x109   : > { %840 = vmatpush3.bf16.msra.mxu1 %v933_v12 }
 0x10c   : > { %842 = vmatmul.mubr.msk.bf16.vlgmr.msra.gmra.mxu1 %vm370_vm2, %v349_v5 }
 0x1c4   : > { %v464_v14 = vpop.f32.mrf.mxu1 }
 0x1c6   : > { %v835_v15 = vpop.f32.mrf.mxu1 }
 0x1c8   : > { %v467_v16 = vpop.f32.mrf.mxu1 }
 0x1ca   : > { %v836_v17 = vpop.f32.mrf.mxu1 }
 0x1cc   : > { %v516_v18 = vpop.f32.mrf.mxu1 }
 0x1cd   : > { %v517_v19 = vadd.f32 %v516_v18, %v464_v14 }
 0x1ce   : > { %v843_v20 = vpop.f32.mrf.mxu1 }
 0x1cf   : > { %563 = vrot.lane.b32.xlu1 %v517_v19, %s1118_s21  ;;  %533 = vrot.lane.b32.xlu0 %v517_v19, %s1119_s17  ;;  %s1297_s21 = sshll.u32 %s326_s13, 3  ;;  %v557_v48 = vmul.f32 %v522_v23, %v517_v19 }
 0x1d0   : > { %v519_v21 = vpop.f32.mrf.mxu1  ;;  %s1422_s17 = scalar_lea.vmem [#allocation10], %s1297_s21 }
 0x1d2   : > { %v844_v22 = vpop.f32.mrf.mxu1 }
 0x1d3   : > { %568 = vrot.lane.b32.xlu1 %v517_v19, %s1120_s19  ;;  %560 = vrot.lane.b32.xlu0 %v517_v19, %s1121_s20  ;;  %s1127_s19 = smov 96   ;;  %s1307_s20 = sshll.u32 %s1197_s9, 7 }
 0x1d4   : > { %s617_s26 = scalar_lea.hbm %s1417_s6, %s1307_s20 }
 0x1d7   : > { %574 = vrot.lane.b32.xlu0 %v522_v23, %s1122_s22 }
 0x1db   : > { %525 = vrot.lane.b32.xlu0 %v517_v19, %s1123_s23 }
 0x1df   : > { %536 = vrot.lane.b32.xlu0 %v517_v19, %s1124_s24 }
 0x1e3   : > { %591 = vrot.lane.b32.xlu0 %v517_v19, %s1125_s25 }
 0x241   : > { %v564_v27 = vpop.permute.xlu1 %563  ;;  %v534_v28 = vpop.permute.xlu0 %533 }
 0x245   : > { %v569_v30 = vpop.permute.xlu1 %568  ;;  %v561_v31 = vpop.permute.xlu0 %560 }
 0x246   : > { %v571_v33 = vsel %vm539_vm4, %v569_v30, %v534_v28  ;;  %v567_v34 = vsel %vm566_vm5, %v561_v31, %v564_v27 }
 0x247   : > { %v572_v35 = vsel %vm1286_vm6, %v567_v34, %v571_v33 }
 0x248   : > { %v578_v36 = vmul.f32 %v572_v35, %v523_v32 }
 0x249   : > { %v575_v37 = vpop.permute.xlu0 %574 }
 0x24a   : > { %580 = vrot.lane.b32.xlu1 %v578_v36, %s1122_s22  ;;  %v577_v42 = vmul.f32 %v575_v37, %v517_v19  ;;  %s328_s22 = scalar_lea.vmem [#allocation7], %s1297_s21 }
 0x24b   : > { %s619_s23 = sshll.u32 %s328_s22, 4  ;;  %s620_s23 = int_to_ptr.vmem [resolvable:$true] %s619_s23 }
 0x24d   : > { %v526_v38 = vpop.permute.xlu0 %525 }
 0x24e   : > { %528 = vrot.lane.b32.xlu1 %v517_v19, %s1126_s18  ;;  %s986_s18 = scalar_lea.vmem %s620_s23, 128 }
 0x24f   : > { %p987_p10 = scmp.ne.s32.totalorder %s620_s23, %s986_s18 }
 0x251   : > { %v537_v39 = vpop.permute.xlu0 %536  ;;  %p988_p12 = pnand %p987_p10, %p1216_p5 }
 0x252   : > { %v540_v40 = vsel %vm539_vm4, %v534_v28, %v537_v39 }
 0x253   : > { %p989_p8 = pneg %p988_p12 }
 0x255   : > { %v592_v41 = vpop.permute.xlu0 %591 }
 0x256   : > { %594 = vst.msk [vmem:[%s1422_s17] sm:$0xff] %vm589_vm7, %v592_v41 }
 0x2bc   : > { %v581_v43 = vpop.permute.xlu1 %580 }
 0x2bd   : > { %v583_v44 = vadd.f32 %v581_v43, %v577_v42 }
 0x2bf   : > { %586 = vrot.lane.b32.xlu1 %v583_v44, %s1127_s19  ;;  %s1128_s19 = smov [#allocation7]  }
 0x2c0   : > { %v529_v45 = vpop.permute.xlu1 %528  ;;  %s990_s10 = sshll.u32 %s1128_s19, 4  ;;  %s991_s10 = int_to_ptr.vmem [resolvable:$false] %s990_s10 }
 0x2c1   : > { %v532_v46 = vsel %vm531_vm8, %v526_v38, %v529_v45  ;;  %s992_s17 = scalar_lea.vmem %s991_s10, 256  ;;  %p993_p11 = scmp.lt.s32.totalorder %s620_s23, %s991_s10 }
 0x2c2   : > { %v556_v47 = vsel %vm1286_vm6, %v532_v46, %v540_v40  ;;  %p994_p0 = scmp.lt.s32.totalorder %s992_s17, %s986_s18 }
 0x2c3   : > { %v558_v49 = vmul.f32 %v556_v47, %v523_v32 }
 0x2c4   : > { %p995_p1 = por %p994_p0, %p993_p11 }
 0x2c5   : > { %v559_v50 = vadd.f32 %v558_v49, %v557_v48 }
 0x2c6   : > { %p996_p3 = pnand %p995_p1, %p989_p8 }
 0x2c7   : > { %584 = vst.msk [vmem:[%s328_s22] sm:$0xff] %vm370_vm2, %v559_v50 }
 0x2c8   : > { %999 = shalt.err (!%p996_p3)
}
 0x2c9   : > { %s1000_s24 = scalar_lea.hbm %s617_s26, 128  ;;  %s1004_s25 = scalar_lea.hbm %s1417_s6, 256 }
 0x2ca   : > { %p1001_p2 = scmp.ne.s32.totalorder %s617_s26, %s1000_s24  ;;  %p1005_p7 = scmp.lt.s32.totalorder %s617_s26, %s1417_s6 }
 0x2cb   : > { %p1006_p6 = scmp.lt.s32.totalorder %s1004_s25, %s1000_s24 }
 0x2cc   : > { %p1002_p4 = pnand %p1001_p2, %p1216_p5 }
 0x2cd   : > { %p1007_p9 = por %p1006_p6, %p1005_p7 }
 0x2ce   : > { %p1003_p13 = pneg %p1002_p4 }
 0x2d0   : > { %p1008_p10 = pnand %p1007_p9, %p1003_p13 }
 0x2d2   : > { %1011 = shalt.err (!%p1008_p10)
}
 0x2d3   : > { %853 = dma.vmem_to_hbm [thread:$0]  (%p1216_p5), %s620_s23, 128, %s617_s26, %s596_s12  }
 0x2d4   : > { %s600_s10 = sand.u32 1, %s1197_s9   ;;  %s335_s17 = scalar_lea.vmem [#allocation8], %s1297_s21 }
 0x2d5   : > { %s632_s18 = sshll.u32 %s335_s17, 4  ;;  %s1437_s19 = scalar_lea.vmem [#allocation10], %s1297_s21  ;;  %s1337_s18 = int_to_ptr.vmem [resolvable:$true] %s632_s18 }
 0x2d6   : > { %s645_s13 = sshll.u32 %s1437_s19, 4  ;;  %s1335_s24 = scalar_lea.hbm %s1418_s7, %s1307_s20  ;;  %s1345_s13 = int_to_ptr.vmem [resolvable:$true] %s645_s13 }
 0x2d7   : > { %s1343_s23 = scalar_lea.hbm %s1419_s8, %s1307_s20  ;;  %s1348_s9 = scalar_lea.sflag [#allocation9], %s600_s10 }
 0x2d8   : > { %s1012_s21 = scalar_lea.vmem %s1337_s18, 128  ;;  %s1129_s26 = smov [#allocation8]  }
 0x2d9   : > { %p1013_p12 = scmp.ne.s32.totalorder %s1337_s18, %s1012_s21  ;;  %s1016_s12 = sshll.u32 %s1129_s26, 4  ;;  %s1017_s12 = int_to_ptr.vmem [resolvable:$false] %s1016_s12 }
 0x2da   : > { %s1018_s19 = scalar_lea.vmem %s1017_s12, 256  ;;  %p1019_p0 = scmp.lt.s32.totalorder %s1337_s18, %s1017_s12 }
 0x2db   : > { %p1014_p8 = pnand %p1013_p12, %p1216_p5  ;;  %p1020_p1 = scmp.lt.s32.totalorder %s1018_s19, %s1012_s21 }
 0x2dd   : > { %p1015_p11 = pneg %p1014_p8  ;;  %p1021_p3 = por %p1020_p1, %p1019_p0 }
 0x2df   : > { %p1022_p2 = pnand %p1021_p3, %p1015_p11 }
 0x331   : > { %v587_v51 = vpop.permute.xlu1 %586 }
 0x332   : > { %590 = vst.msk [vmem:[%s335_s17] sm:$0xff] %vm589_vm7, %v587_v51 }
 0x333   : > { %1025 = shalt.err (!%p1022_p2)
}
 0x334   : > { %s1026_s20 = scalar_lea.hbm %s1335_s24, 128  ;;  %s1030_s0 = scalar_lea.hbm %s1418_s7, 256 }
 0x335   : > { %p1027_p4 = scmp.ne.s32.totalorder %s1335_s24, %s1026_s20  ;;  %p1031_p6 = scmp.lt.s32.totalorder %s1335_s24, %s1418_s7 }
 0x336   : > { %p1032_p9 = scmp.lt.s32.totalorder %s1030_s0, %s1026_s20 }
 0x337   : > { %p1028_p13 = pnand %p1027_p4, %p1216_p5 }
 0x338   : > { %p1033_p10 = por %p1032_p9, %p1031_p6 }
 0x339   : > { %p1029_p7 = pneg %p1028_p13 }
 0x33b   : > { %p1034_p12 = pnand %p1033_p10, %p1029_p7 }
 0x33d   : > { %1037 = shalt.err (!%p1034_p12)
}
 0x33e   : > { %854 = dma.vmem_to_hbm [thread:$0]  (%p1216_p5), %s1337_s18, 128, %s1335_s24, %s1348_s9  }
 0x33f   : > { %s1038_s25 = scalar_lea.vmem %s1345_s13, 128  ;;  %s1130_s21 = smov [#allocation10]  }
 0x340   : > { %p1039_p8 = scmp.ne.s32.totalorder %s1345_s13, %s1038_s25  ;;  %s1042_s26 = sshll.u32 %s1130_s21, 4  ;;  %s1043_s26 = int_to_ptr.vmem [resolvable:$false] %s1042_s26 }
 0x341   : > { %s1044_s12 = scalar_lea.vmem %s1043_s26, 256  ;;  %p1045_p1 = scmp.lt.s32.totalorder %s1345_s13, %s1043_s26 }
 0x342   : > { %p1040_p11 = pnand %p1039_p8, %p1216_p5  ;;  %p1046_p3 = scmp.lt.s32.totalorder %s1044_s12, %s1038_s25 }
 0x344   : > { %p1041_p0 = pneg %p1040_p11  ;;  %p1047_p2 = por %p1046_p3, %p1045_p1 }
 0x346   : > { %p1048_p4 = pnand %p1047_p2, %p1041_p0 }
 0x348   : > { %1051 = shalt.err (!%p1048_p4)
}
 0x349   : > { %s1052_s19 = scalar_lea.hbm %s1343_s23, 128  ;;  %s1056_s20 = scalar_lea.hbm %s1419_s8, 256 }
 0x34a   : > { %p1053_p13 = scmp.ne.s32.totalorder %s1343_s23, %s1052_s19  ;;  %p1057_p9 = scmp.lt.s32.totalorder %s1343_s23, %s1419_s8 }
 0x34b   : > { %p1058_p10 = scmp.lt.s32.totalorder %s1056_s20, %s1052_s19 }
 0x34c   : > { %p1054_p7 = pnand %p1053_p13, %p1216_p5 }
 0x34d   : > { %p1059_p12 = por %p1058_p10, %p1057_p9 }
 0x34e   : > { %p1055_p6 = pneg %p1054_p7 }
 0x350   : > { %p1060_p8 = pnand %p1059_p12, %p1055_p6 }
 0x352   : > { %1063 = shalt.err (!%p1060_p8)
}
 0x353   : > { %855 = dma.vmem_to_hbm [thread:$0]  (%p1216_p5), %s1345_s13, 128, %s1343_s23, %s1348_s9  }
 0x354 PF: > { %p880_p11 = scmp.ge.s32.totalorder %s1110_s30, 2  ;;  %s657_s0 = sand.u32 1, %s1098_s27  }
 0x355   : > { %p1438_p0 = scmp.ne.s32.totalorder %s1426_s16, 0  ;;  %s658_s1 = scalar_lea.sflag [#allocation4], %s657_s0 }
 0x357   : > { %p867_p1 = pnand %p880_p11, %p1438_p0 }
 0x359   : > { %p868_p3 = pneg %p867_p1 }
 0x35b   : > { %1089 = dma.done.wait (%p868_p3), %s658_s1, 128  }
 0x35c   : > { %1091 = vsyncadd (%p868_p3), %s658_s1, 4294967168  ;;  %s1439_s22 = sadd.s32 4294967294, %s1110_s30  }
 0x35d   : > { %s666_s25 = sand.u32 1, %s1439_s22  }
 0x35e   : > { %s667_s15 = scalar_lea.sflag [#allocation9], %s666_s25 }
 0x35f   : > { %1093 = dma.done.wait (%p868_p3), %s667_s15, 256  }
 0x360   : > { %1095 = vsyncadd (%p868_p3), %s667_s15, 4294967040  ;;  %p24_p5 = scmp.ge.s32.totalorder %s1201_s11, 4   ;;  %s1440_s27 = smov %s1102_s28 }
 0x361   : > { %s1441_s28 = smov %s1106_s29  ;;  %s1442_s29 = smov %s1214_s14 }
 0x362   : > { %s1443_s30 = smov %s1201_s11  ;;  %26 = sbr.rel (!%p24_p5) target bundleno = 10 (0xa), region = 120 }
 0x367   :  { %681 = vsyncpa [#allocation3], 1 }
 0x368   :  { %683 = vsyncpa [#allocation3 + $0x1], 1 }
 0x369   :  { %684 = vsyncpa [#allocation6], 1 }
 0x36a   :  { %685 = vsyncpa [#allocation4], 1 }
 0x36b   :  { %687 = vsyncpa [#allocation4 + $0x1], 1 }
 0x36c   :  { %688 = vsyncpa [#allocation9], 1 }
 0x36d   :  { %690 = vsyncpa [#allocation9 + $0x1], 1 }

</bundles_post_ra>
